<compile_context>
chip_gen: v6e
topology: v6e:2x2x1
jax: 0.10.0
libtpu: 0.0.40
codegen_flags: <defaults>
</compile_context>

<pallas_src>
import jax
import jax.numpy as jnp
import numpy as np
from jax import lax
from jax.experimental import pallas as pl
from jax.experimental.pallas import tpu as pltpu

EPS = 1e-5  # nn.BatchNorm1d default eps


def _make_kernel(L, TL):
    """Fused residual-block kernel for fixed spatial length L, processing the
    spatial axis in static chunks of at most TL rows."""
    chunks = [(s, min(TL, L - s)) for s in range(0, L, TL)]

    def kernel(x_ref, w1_ref, b1_ref, w2_ref, b2_ref, out_ref, xpad_ref, hpad_ref):
        # x_ref : (B_blk, L, Cin) bf16   streamed input (also the shortcut)
        # w1_ref: (3, Cin, P)     bf16   conv1 weights, BN1 folded (resident)
        # b1_ref: (1, P)          f32    folded BN1 bias (resident)
        # w2_ref: (3, P, P)       bf16   conv2 weights, BN2 folded (resident)
        # b2_ref: (1, P)          f32    folded BN2 bias (resident)
        # out_ref:(B_blk, L, P)   f32
        # xpad_ref/hpad_ref: VMEM (L+2, Cin)/(L+2, P) bf16 padded scratches
        b_blk, _, cin = x_ref.shape
        plane = out_ref.shape[2]

        # Zero only the spatial halo rows (row 0 and row L+1) of both padded
        # scratches; interior rows 1..L are fully overwritten per sample.
        # Done every grid step (cheap: 4 tiny stores) rather than under
        # pl.when(pid == 0), which is unsafe when the parallel batch axis is
        # split across TensorCores.
        xpad_ref[pl.ds(0, 1), :] = jnp.zeros((1, cin), xpad_ref.dtype)
        xpad_ref[pl.ds(L + 1, 1), :] = jnp.zeros((1, cin), xpad_ref.dtype)
        hpad_ref[pl.ds(0, 1), :] = jnp.zeros((1, plane), hpad_ref.dtype)
        hpad_ref[pl.ds(L + 1, 1), :] = jnp.zeros((1, plane), hpad_ref.dtype)

        for b in range(b_blk):  # static unroll over the samples of this block
            # ---- stage x[b] into the padded scratch (chunk-wise, bf16) ----
            for (s, n) in chunks:
                xpad_ref[pl.ds(1 + s, n), :] = x_ref[b, pl.ds(s, n), :]

            # ---- conv1 (+BN1 folded) + ReLU -> hpad interior ----
            # nn.Dropout after the ReLU is an inference-mode no-op.
            for (s, n) in chunks:
                h = jnp.dot(xpad_ref[pl.ds(s, n), :], w1_ref[0],
                            preferred_element_type=jnp.float32)
                h = h + jnp.dot(xpad_ref[pl.ds(s + 1, n), :], w1_ref[1],
                                preferred_element_type=jnp.float32)
                h = h + jnp.dot(xpad_ref[pl.ds(s + 2, n), :], w1_ref[2],
                                preferred_element_type=jnp.float32)
                h = jnp.maximum(h + b1_ref[...], 0.0)
                hpad_ref[pl.ds(1 + s, n), :] = h.astype(hpad_ref.dtype)

            # ---- conv2 (+BN2 folded) + identity shortcut + ReLU -> out ----
            for (s, n) in chunks:
                o = jnp.dot(hpad_ref[pl.ds(s, n), :], w2_ref[0],
                            preferred_element_type=jnp.float32)
                o = o + jnp.dot(hpad_ref[pl.ds(s + 1, n), :], w2_ref[1],
                                preferred_element_type=jnp.float32)
                o = o + jnp.dot(hpad_ref[pl.ds(s + 2, n), :], w2_ref[2],
                                preferred_element_type=jnp.float32)
                o = o + b2_ref[...] + x_ref[b, pl.ds(s, n), :].astype(jnp.float32)
                out_ref[b, pl.ds(s, n), :] = jnp.maximum(o, 0.0).astype(out_ref.dtype)

    return kernel


def _fold_bn_into_conv(w, gamma, beta, mean, var):
    """w: PyTorch Conv1d layout (out, in, k).  Returns bf16 (k, in, out) scaled
    weights and f32 (1, out) bias so conv(x) @ W' + b' == BN(conv(x)) (eval)."""
    scale = gamma * jax.lax.rsqrt(var + EPS)           # (out,)
    w_t = jnp.transpose(w, (2, 1, 0)) * scale          # (k, in, out) * (out,)
    bias = (beta - mean * scale)[None, :]              # (1, out)
    return w_t.astype(jnp.bfloat16), bias.astype(jnp.float32)


def _pick_b_blk(n):
    """Samples per grid step: amortize grid-step overhead but keep >= 2 grid
    steps so the parallel batch axis can shard across two TensorCores."""
    for b in (8, 4, 2, 1):
        if n % b == 0 and n // b >= 2:
            return b
    return 1


def residual_block_forward(x, params):
    """x: (N, C_in, L) in PyTorch Conv1d layout.  Returns (N, plane, L) f32."""
    w1 = params['conv1_w']                              # (plane, inplane, 3)
    w2 = params['conv2_w']                              # (plane, plane, 3)
    plane, cin, _ = w1.shape
    N, C, L = x.shape
    assert C == cin and plane == cin, "identity shortcut requires inplane == plane"
    # TODO(synk): downsample submodule / stride != 1 path not implemented
    # (spec default downsample=None, stride=1 -> identity shortcut).

    w1f, b1f = _fold_bn_into_conv(w1, *params['bn1'])
    w2f, b2f = _fold_bn_into_conv(w2, *params['bn2'])

    # Channels-last, bf16, un-padded: the only streamed activation.
    # TODO(synk): keep the surrounding model channels-last end-to-end to drop
    # these two transposes (they each materialize the array in HBM).
    x_nlc = jnp.transpose(x, (0, 2, 1)).astype(jnp.bfloat16)   # (N, L, C)

    b_blk = _pick_b_blk(N)
    TL = min(L, 512)  # static spatial chunk -> bounded vreg pressure at any L
    kernel = _make_kernel(L, TL)

    out_nlc = pl.pallas_call(
        kernel,
        out_shape=jax.ShapeDtypeStruct((N, L, plane), jnp.float32),
        grid=(N // b_blk,),
        in_specs=[
            pl.BlockSpec((b_blk, L, cin), lambda i: (i, 0, 0)),    # x (streamed)
            pl.BlockSpec((3, cin, plane), lambda i: (0, 0, 0)),    # w1 (resident)
            pl.BlockSpec((1, plane), lambda i: (0, 0)),            # b1 (resident)
            pl.BlockSpec((3, plane, plane), lambda i: (0, 0, 0)),  # w2 (resident)
            pl.BlockSpec((1, plane), lambda i: (0, 0)),            # b2 (resident)
        ],
        out_specs=pl.BlockSpec((b_blk, L, plane), lambda i: (i, 0, 0)),
        scratch_shapes=[
            pltpu.VMEM((L + 2, cin), jnp.bfloat16),    # padded x scratch
            pltpu.VMEM((L + 2, plane), jnp.bfloat16),  # padded conv1-out scratch
        ],
        compiler_params=pltpu.CompilerParams(
            dimension_semantics=("parallel",),      # batch blocks independent
            vmem_limit_bytes=48 * 1024 * 1024,      # within v7x's 64 MiB VMEM
        ),
    )(x_nlc, w1f, b1f, w2f, b2f)

    return jnp.transpose(out_nlc, (0, 2, 1))  # back to (N, C, L)


# ----------------------------- reference & test -----------------------------

def init_params(key, inplane, plane):
    keys = jax.random.split(key, 6)
    conv1_w = 0.1 * jax.random.normal(keys[0], (plane, inplane, 3), jnp.float32)
    conv2_w = 0.1 * jax.random.normal(keys[1], (plane, plane, 3), jnp.float32)

    def bn(k1, k2, d):
        gamma = 1.0 + 0.1 * jax.random.normal(k1, (d,), jnp.float32)
        beta = 0.1 * jax.random.normal(k2, (d,), jnp.float32)
        mean = 0.1 * jax.random.normal(jax.random.fold_in(k1, 1), (d,), jnp.float32)
        var = 0.5 + jax.random.uniform(jax.random.fold_in(k2, 1), (d,), jnp.float32)
        return gamma, beta, mean, var

    return {
        'conv1_w': conv1_w, 'bn1': bn(keys[2], keys[3], plane),
        'conv2_w': conv2_w, 'bn2': bn(keys[4], keys[5], plane),
    }


def reference_forward(x, params):
    """Pure-JAX f32 reference matching the PyTorch eval-mode ResidualBlock."""
    def conv1d(h, w):  # h: (N, C, L); w: (out, in, k); stride=1, padding=1
        return lax.conv_general_dilated(
            h, w, window_strides=(1,), padding=((1, 1),),
            dimension_numbers=('NCH', 'OIH', 'NCH'))

    def bn(h, gamma, beta, mean, var):
        return ((h - mean[None, :, None]) * jax.lax.rsqrt(var[None, :, None] + EPS)
                * gamma[None, :, None] + beta[None, :, None])

    h = conv1d(x, params['conv1_w'])
    h = jnp.maximum(bn(h, *params['bn1']), 0.0)
    h = conv1d(h, params['conv2_w'])
    h = bn(h, *params['bn2'])
    return jnp.maximum(h + x, 0.0)


if __name__ == "__main__":
    key = jax.random.PRNGKey(0)
    N, C, L = 2, 4, 16           # batch, inplane == plane, spatial length
    pkey, xkey = jax.random.split(key)
    params = init_params(pkey, inplane=C, plane=C)
    x = jax.random.normal(xkey, (N, C, L), jnp.float32)

    out = residual_block_forward(x, params)
    out = jax.block_until_ready(out)
    assert out.shape == (N, C, L)

    ref = reference_forward(x, params)
    # bf16 matmul operands (f32 accumulation) -> slightly looser tolerance.
    np.testing.assert_allclose(np.asarray(out), np.asarray(ref), rtol=2e-2, atol=2e-2)
    print("KERNEL_OK")
</pallas_src>

<mosaic_0001>
module attributes {stable_mosaic.version = 11 : i64} {
  func.func @kernel(%arg0: i32, %arg1: memref<1x16x4xbf16, #tpu.memory_space<vmem>>, %arg2: memref<3x4x4xbf16, #tpu.memory_space<vmem>>, %arg3: memref<1x4xf32, #tpu.memory_space<vmem>>, %arg4: memref<3x4x4xbf16, #tpu.memory_space<vmem>>, %arg5: memref<1x4xf32, #tpu.memory_space<vmem>>, %arg6: memref<1x16x4xf32, #tpu.memory_space<vmem>>, %arg7: memref<18x4xbf16, #tpu.memory_space<vmem>>, %arg8: memref<18x4xbf16, #tpu.memory_space<vmem>>) attributes {dimension_semantics = [#tpu.dimension_semantics<parallel>], iteration_bounds = array<i64: 2>, scalar_prefetch = 0 : i64, scratch_operands = 2 : i64, tpu.core_type = #tpu.core_type<tc>, window_params = [{transform_indices = @transform_0, window_bounds = array<i64: 1, 16, 4>}, {pipeline_mode = #tpu.pipeline_mode<synchronous>, transform_indices = @transform_1, window_bounds = array<i64: 3, 4, 4>}, {pipeline_mode = #tpu.pipeline_mode<synchronous>, transform_indices = @transform_2, window_bounds = array<i64: 1, 4>}, {pipeline_mode = #tpu.pipeline_mode<synchronous>, transform_indices = @transform_3, window_bounds = array<i64: 3, 4, 4>}, {pipeline_mode = #tpu.pipeline_mode<synchronous>, transform_indices = @transform_4, window_bounds = array<i64: 1, 4>}, {transform_indices = @transform_5, window_bounds = array<i64: 1, 16, 4>}]} {
    %cst = arith.constant 0.000000e+00 : bf16
    %0 = vector.broadcast %cst : bf16 to vector<1x4xbf16>
    %c0 = arith.constant 0 : index
    %c0_0 = arith.constant 0 : index
    %1 = vector.load %arg7[%c0, %c0_0] : memref<18x4xbf16, #tpu.memory_space<vmem>>, vector<1x4xbf16>
    tpu.vector_store %arg7[%c0, %c0_0], %0 {strides = array<i32>} : memref<18x4xbf16, #tpu.memory_space<vmem>>, vector<1x4xbf16>,
    %cst_1 = arith.constant 0.000000e+00 : bf16
    %2 = vector.broadcast %cst_1 : bf16 to vector<1x4xbf16>
    %c17 = arith.constant 17 : index
    %c0_2 = arith.constant 0 : index
    %3 = vector.load %arg7[%c17, %c0_2] : memref<18x4xbf16, #tpu.memory_space<vmem>>, vector<1x4xbf16>
    tpu.vector_store %arg7[%c17, %c0_2], %2 {strides = array<i32>} : memref<18x4xbf16, #tpu.memory_space<vmem>>, vector<1x4xbf16>,
    %cst_3 = arith.constant 0.000000e+00 : bf16
    %4 = vector.broadcast %cst_3 : bf16 to vector<1x4xbf16>
    %c0_4 = arith.constant 0 : index
    %c0_5 = arith.constant 0 : index
    %5 = vector.load %arg8[%c0_4, %c0_5] : memref<18x4xbf16, #tpu.memory_space<vmem>>, vector<1x4xbf16>
    tpu.vector_store %arg8[%c0_4, %c0_5], %4 {strides = array<i32>} : memref<18x4xbf16, #tpu.memory_space<vmem>>, vector<1x4xbf16>,
    %cst_6 = arith.constant 0.000000e+00 : bf16
    %6 = vector.broadcast %cst_6 : bf16 to vector<1x4xbf16>
    %c17_7 = arith.constant 17 : index
    %c0_8 = arith.constant 0 : index
    %7 = vector.load %arg8[%c17_7, %c0_8] : memref<18x4xbf16, #tpu.memory_space<vmem>>, vector<1x4xbf16>
    tpu.vector_store %arg8[%c17_7, %c0_8], %6 {strides = array<i32>} : memref<18x4xbf16, #tpu.memory_space<vmem>>, vector<1x4xbf16>,
    %c0_9 = arith.constant 0 : index
    %c0_10 = arith.constant 0 : index
    %c0_11 = arith.constant 0 : index
    %8 = vector.load %arg1[%c0_9, %c0_10, %c0_11] : memref<1x16x4xbf16, #tpu.memory_space<vmem>>, vector<1x16x4xbf16>
    %9 = vector.shape_cast %8 : vector<1x16x4xbf16> to vector<16x4xbf16>
    %c1 = arith.constant 1 : index
    %c0_12 = arith.constant 0 : index
    %10 = vector.load %arg7[%c1, %c0_12] : memref<18x4xbf16, #tpu.memory_space<vmem>>, vector<16x4xbf16>
    tpu.vector_store %arg7[%c1, %c0_12], %9 {strides = array<i32>} : memref<18x4xbf16, #tpu.memory_space<vmem>>, vector<16x4xbf16>,
    %c0_13 = arith.constant 0 : index
    %c0_14 = arith.constant 0 : index
    %11 = vector.load %arg7[%c0_13, %c0_14] : memref<18x4xbf16, #tpu.memory_space<vmem>>, vector<16x4xbf16>
    %c0_15 = arith.constant 0 : index
    %c0_16 = arith.constant 0 : index
    %c0_17 = arith.constant 0 : index
    %12 = vector.load %arg2[%c0_15, %c0_16, %c0_17] : memref<3x4x4xbf16, #tpu.memory_space<vmem>>, vector<1x4x4xbf16>
    %13 = vector.shape_cast %12 : vector<1x4x4xbf16> to vector<4x4xbf16>
    %cst_18 = arith.constant dense<0.000000e+00> : vector<16x4xf32>
    %14 = tpu.matmul %11, %13, %cst_18 {dimension_numbers = #tpu.dot_dimension_numbers<[1], [0], [0], [1], [0, 0, 1, 1], [], []>} : vector<16x4xbf16>, vector<4x4xbf16>, vector<16x4xf32> -> vector<16x4xf32>
    %c1_19 = arith.constant 1 : index
    %c0_20 = arith.constant 0 : index
    %15 = vector.load %arg7[%c1_19, %c0_20] : memref<18x4xbf16, #tpu.memory_space<vmem>>, vector<16x4xbf16>
    %c1_21 = arith.constant 1 : index
    %c0_22 = arith.constant 0 : index
    %c0_23 = arith.constant 0 : index
    %16 = vector.load %arg2[%c1_21, %c0_22, %c0_23] : memref<3x4x4xbf16, #tpu.memory_space<vmem>>, vector<1x4x4xbf16>
    %17 = vector.shape_cast %16 : vector<1x4x4xbf16> to vector<4x4xbf16>
    %cst_24 = arith.constant dense<0.000000e+00> : vector<16x4xf32>
    %18 = tpu.matmul %15, %17, %cst_24 {dimension_numbers = #tpu.dot_dimension_numbers<[1], [0], [0], [1], [0, 0, 1, 1], [], []>} : vector<16x4xbf16>, vector<4x4xbf16>, vector<16x4xf32> -> vector<16x4xf32>
    %19 = arith.addf %14, %18 : vector<16x4xf32>
    %c2 = arith.constant 2 : index
    %c0_25 = arith.constant 0 : index
    %20 = vector.load %arg7[%c2, %c0_25] : memref<18x4xbf16, #tpu.memory_space<vmem>>, vector<16x4xbf16>
    %c2_26 = arith.constant 2 : index
    %c0_27 = arith.constant 0 : index
    %c0_28 = arith.constant 0 : index
    %21 = vector.load %arg2[%c2_26, %c0_27, %c0_28] : memref<3x4x4xbf16, #tpu.memory_space<vmem>>, vector<1x4x4xbf16>
    %22 = vector.shape_cast %21 : vector<1x4x4xbf16> to vector<4x4xbf16>
    %cst_29 = arith.constant dense<0.000000e+00> : vector<16x4xf32>
    %23 = tpu.matmul %20, %22, %cst_29 {dimension_numbers = #tpu.dot_dimension_numbers<[1], [0], [0], [1], [0, 0, 1, 1], [], []>} : vector<16x4xbf16>, vector<4x4xbf16>, vector<16x4xf32> -> vector<16x4xf32>
    %24 = arith.addf %19, %23 : vector<16x4xf32>
    %c0_30 = arith.constant 0 : index
    %c0_31 = arith.constant 0 : index
    %25 = vector.load %arg3[%c0_30, %c0_31] : memref<1x4xf32, #tpu.memory_space<vmem>>, vector<1x4xf32>
    %26 = vector.broadcast %25 : vector<1x4xf32> to vector<16x4xf32>
    %27 = arith.addf %24, %26 : vector<16x4xf32>
    %cst_32 = arith.constant 0.000000e+00 : f32
    %28 = vector.broadcast %cst_32 : f32 to vector<16x4xf32>
    %29 = arith.maximumf %27, %28 : vector<16x4xf32>
    %30 = arith.truncf %29 : vector<16x4xf32> to vector<16x4xbf16>
    %c1_33 = arith.constant 1 : index
    %c0_34 = arith.constant 0 : index
    %31 = vector.load %arg8[%c1_33, %c0_34] : memref<18x4xbf16, #tpu.memory_space<vmem>>, vector<16x4xbf16>
    tpu.vector_store %arg8[%c1_33, %c0_34], %30 {strides = array<i32>} : memref<18x4xbf16, #tpu.memory_space<vmem>>, vector<16x4xbf16>,
    %c0_35 = arith.constant 0 : index
    %c0_36 = arith.constant 0 : index
    %32 = vector.load %arg8[%c0_35, %c0_36] : memref<18x4xbf16, #tpu.memory_space<vmem>>, vector<16x4xbf16>
    %c0_37 = arith.constant 0 : index
    %c0_38 = arith.constant 0 : index
    %c0_39 = arith.constant 0 : index
    %33 = vector.load %arg4[%c0_37, %c0_38, %c0_39] : memref<3x4x4xbf16, #tpu.memory_space<vmem>>, vector<1x4x4xbf16>
    %34 = vector.shape_cast %33 : vector<1x4x4xbf16> to vector<4x4xbf16>
    %cst_40 = arith.constant dense<0.000000e+00> : vector<16x4xf32>
    %35 = tpu.matmul %32, %34, %cst_40 {dimension_numbers = #tpu.dot_dimension_numbers<[1], [0], [0], [1], [0, 0, 1, 1], [], []>} : vector<16x4xbf16>, vector<4x4xbf16>, vector<16x4xf32> -> vector<16x4xf32>
    %c1_41 = arith.constant 1 : index
    %c0_42 = arith.constant 0 : index
    %36 = vector.load %arg8[%c1_41, %c0_42] : memref<18x4xbf16, #tpu.memory_space<vmem>>, vector<16x4xbf16>
    %c1_43 = arith.constant 1 : index
    %c0_44 = arith.constant 0 : index
    %c0_45 = arith.constant 0 : index
    %37 = vector.load %arg4[%c1_43, %c0_44, %c0_45] : memref<3x4x4xbf16, #tpu.memory_space<vmem>>, vector<1x4x4xbf16>
    %38 = vector.shape_cast %37 : vector<1x4x4xbf16> to vector<4x4xbf16>
    %cst_46 = arith.constant dense<0.000000e+00> : vector<16x4xf32>
    %39 = tpu.matmul %36, %38, %cst_46 {dimension_numbers = #tpu.dot_dimension_numbers<[1], [0], [0], [1], [0, 0, 1, 1], [], []>} : vector<16x4xbf16>, vector<4x4xbf16>, vector<16x4xf32> -> vector<16x4xf32>
    %40 = arith.addf %35, %39 : vector<16x4xf32>
    %c2_47 = arith.constant 2 : index
    %c0_48 = arith.constant 0 : index
    %41 = vector.load %arg8[%c2_47, %c0_48] : memref<18x4xbf16, #tpu.memory_space<vmem>>, vector<16x4xbf16>
    %c2_49 = arith.constant 2 : index
    %c0_50 = arith.constant 0 : index
    %c0_51 = arith.constant 0 : index
    %42 = vector.load %arg4[%c2_49, %c0_50, %c0_51] : memref<3x4x4xbf16, #tpu.memory_space<vmem>>, vector<1x4x4xbf16>
    %43 = vector.shape_cast %42 : vector<1x4x4xbf16> to vector<4x4xbf16>
    %cst_52 = arith.constant dense<0.000000e+00> : vector<16x4xf32>
    %44 = tpu.matmul %41, %43, %cst_52 {dimension_numbers = #tpu.dot_dimension_numbers<[1], [0], [0], [1], [0, 0, 1, 1], [], []>} : vector<16x4xbf16>, vector<4x4xbf16>, vector<16x4xf32> -> vector<16x4xf32>
    %45 = arith.addf %40, %44 : vector<16x4xf32>
    %c0_53 = arith.constant 0 : index
    %c0_54 = arith.constant 0 : index
    %46 = vector.load %arg5[%c0_53, %c0_54] : memref<1x4xf32, #tpu.memory_space<vmem>>, vector<1x4xf32>
    %47 = vector.broadcast %46 : vector<1x4xf32> to vector<16x4xf32>
    %48 = arith.addf %45, %47 : vector<16x4xf32>
    %c0_55 = arith.constant 0 : index
    %c0_56 = arith.constant 0 : index
    %c0_57 = arith.constant 0 : index
    %49 = vector.load %arg1[%c0_55, %c0_56, %c0_57] : memref<1x16x4xbf16, #tpu.memory_space<vmem>>, vector<1x16x4xbf16>
    %50 = vector.shape_cast %49 : vector<1x16x4xbf16> to vector<16x4xbf16>
    %51 = arith.extf %50 : vector<16x4xbf16> to vector<16x4xf32>
    %52 = arith.addf %48, %51 : vector<16x4xf32>
    %cst_58 = arith.constant 0.000000e+00 : f32
    %53 = vector.broadcast %cst_58 : f32 to vector<16x4xf32>
    %54 = arith.maximumf %52, %53 : vector<16x4xf32>
    %c0_59 = arith.constant 0 : index
    %c0_60 = arith.constant 0 : index
    %c0_61 = arith.constant 0 : index
    %55 = vector.load %arg6[%c0_59, %c0_60, %c0_61] : memref<1x16x4xf32, #tpu.memory_space<vmem>>, vector<1x16x4xf32>
    %56 = vector.shape_cast %55 : vector<1x16x4xf32> to vector<16x4xf32>
    %57 = vector.shape_cast %54 : vector<16x4xf32> to vector<1x16x4xf32>
    tpu.vector_store %arg6[%c0_59, %c0_60, %c0_61], %57 {strides = array<i32>} : memref<1x16x4xf32, #tpu.memory_space<vmem>>, vector<1x16x4xf32>,
    return
  }
  func.func @transform_0(%arg0: i32) -> (i32, i32, i32) {
    %c0_i32 = arith.constant 0 : i32
    %c0_i32_0 = arith.constant 0 : i32
    %c0_i32_1 = arith.constant 0 : i32
    return %arg0, %c0_i32, %c0_i32_0 : i32, i32, i32
  }
  func.func @transform_1(%arg0: i32) -> (i32, i32, i32) {
    %c0_i32 = arith.constant 0 : i32
    %c0_i32_0 = arith.constant 0 : i32
    %c0_i32_1 = arith.constant 0 : i32
    %c0_i32_2 = arith.constant 0 : i32
    return %c0_i32, %c0_i32_0, %c0_i32_1 : i32, i32, i32
  }
  func.func @transform_2(%arg0: i32) -> (i32, i32) {
    %c0_i32 = arith.constant 0 : i32
    %c0_i32_0 = arith.constant 0 : i32
    %c0_i32_1 = arith.constant 0 : i32
    return %c0_i32, %c0_i32_0 : i32, i32
  }
  func.func @transform_3(%arg0: i32) -> (i32, i32, i32) {
    %c0_i32 = arith.constant 0 : i32
    %c0_i32_0 = arith.constant 0 : i32
    %c0_i32_1 = arith.constant 0 : i32
    %c0_i32_2 = arith.constant 0 : i32
    return %c0_i32, %c0_i32_0, %c0_i32_1 : i32, i32, i32
  }
  func.func @transform_4(%arg0: i32) -> (i32, i32) {
    %c0_i32 = arith.constant 0 : i32
    %c0_i32_0 = arith.constant 0 : i32
    %c0_i32_1 = arith.constant 0 : i32
    return %c0_i32, %c0_i32_0 : i32, i32
  }
  func.func @transform_5(%arg0: i32) -> (i32, i32, i32) {
    %c0_i32 = arith.constant 0 : i32
    %c0_i32_0 = arith.constant 0 : i32
    %c0_i32_1 = arith.constant 0 : i32
    return %arg0, %c0_i32, %c0_i32_0 : i32, i32, i32
  }
}

</mosaic_0001>

<bundles_post_ra>
// kernel: tpu_custom_call.1
= control target key start
LH: loop header
LB: loop body
LE: loop exit
PB: predicated region body
PF: predicated region fallthrough
CT: control target
= control target key end

     0   :  { %s896_s18 = smov 0   ;;  %s1025_s0 = inlined_call_operand.vmem [shape: bf16[2,16,4], index: 0, kind: input, shape index: {}]   ;;  %s1026_s1 = inlined_call_operand.vmem [shape: bf16[3,4,4], index: 1, kind: input, shape index: {}]   ;;  %s1027_s2 = inlined_call_operand.vmem [shape: f32[1,4], index: 2, kind: input, shape index: {}]   ;;  %s1028_s3 = inlined_call_operand.vmem [shape: bf16[3,4,4], index: 3, kind: input, shape index: {}]   ;;  %s1029_s4 = inlined_call_operand.vmem [shape: f32[1,4], index: 4, kind: input, shape index: {}]   ;;  %s1030_s5 = inlined_call_operand.vmem [shape: f32[2,16,4], index: 5, kind: output, shape index: {}]  }
   0x1 LB: > { %s753_s19 = sadd.s32 4294967295, %s862_s18   ;;  %p757_p0 = scmp.ge.s32.totalorder %s862_s18, 1  ;;  %s862_s18 = sphi %s896_s18, %s15_s18  }
   0x2   : > { %p187_p1 = scmp.lt.s32.totalorder %s862_s18, 3 }
   0x4   : > { %p188_p2 = pnand %p757_p0, %p187_p1 }
   0x5   : > { %p215_p3 = scmp.lt.s32.totalorder (!%p188_p2), %s753_s19, 1 }
   0x6   : > { %191 = sbr.rel (%p188_p2) target bundleno = 492 (0x1ec), region = 40 }
   0xb   : > { %v762_v0 = vld [vmem:[%s1026_s1 + $0x2] sm:$0x3]  ;;  %vm308_vm0 = vcmask 1041408   ;;  %v279_v1 = vld [vmem:[%s1026_s1] sm:$0x3]  ;;  %v864_v2 = vmov 0.0  }
   0xc   : > { %804 = vmatprep.subr.bf16.mxu0 %v864_v2  ;;  %v310_v3 = vsel %vm308_vm0, %v762_v0, 0  ;;  %810 = vmatprep.subr.bf16.mxu1 %v864_v2  ;;  %v356_v4 = vsel %vm308_vm0, %v279_v1, 0  ;;  %vm226_vm1 = vcmask 24576   ;;  %vm227_vm2 = vsmask.f32 256  ;;  %s1040_s19 = smov (!%p215_p3, %s753_s19), 1 }
   0xd   : > { %805 = vmatpush3.bf16.msra.mxu0 %v310_v3  ;;  %811 = vmatpush3.bf16.msra.mxu1 %v356_v4  ;;  %v229_v5 = vld [vmem:[#allocation2] sm:$0x1]  ;;  %vm232_vm3 = vsmask.f32 7938  ;;  %vm865_vm4 = vmmov 0   ;;  %vm921_vm5 = vmand %vm226_vm1, %vm227_vm2  ;;  %s784_s24 = sshll.u32 %s1040_s19, 3 }
   0xe   : > { %806 = vmatprep.mubr.msk.bf16.mxu0 %vm865_vm4, %v864_v2  ;;  %812 = vmatprep.mubr.msk.bf16.mxu1 %vm865_vm4, %v864_v2  ;;  %v234_v7 = vld [vmem:[#allocation2 + $0x8] sm:$0x1]  ;;  %v230_v8 = vsel %vm921_vm5, 0, %v229_v5  ;;  %vm929_vm6 = vmand %vm226_vm1, %vm232_vm3  ;;  %s940_s27 = scalar_lea.vmem %s1025_s0, %s784_s24  ;;  %vm245_vm7 = vsmask.f32 4368  ;;  %vm267_vm8 = vcmask 27648  }
   0xf   : > { %816 = vmatprep.subr.bf16.mxu0 %v864_v2  ;;  %822 = vmatprep.subr.bf16.mxu1 %v864_v2  ;;  %231 = vst [vmem:[#allocation2] sm:$0x1] %v230_v8  ;;  %v235_v10 = vsel %vm929_vm6, 0, %v234_v7  ;;  %v243_v11 = vld [vmem:[%s940_s27] sm:$0xf]  ;;  %vm945_vm9 = vmor %vm227_vm2, %vm245_vm7  ;;  %vm304_vm11 = vcmask 31744  }
  0x10   : > { %236 = vst [vmem:[#allocation2 + $0x8] sm:$0x1] %v235_v10  ;;  %v244_v12 = vld [vmem:[%s940_s27 + $0x4] sm:$0xf]  ;;  %v248_v13 = vshrl.u32 %v243_v11, 16  ;;  %v251_v14 = vshll.u32 %v243_v11, 16  ;;  %vm951_vm10 = vmand %vm267_vm8, %vm232_vm3 }
  0x11   : > { %v256_v15 = vshrl.u32 %v244_v12, 16  ;;  %v259_v16 = vshll.u32 %v244_v12, 16  ;;  %v767_v40 = vld [vmem:[%s1026_s1 + $0x4] sm:$0x3]  ;;  %vm291_vm12 = vsmask.f32 7424 }
  0x12   : > { %v250_v18 = vrot.slane %v248_v13, 7  ;;  %v413_v43 = vsel %vm308_vm0, %v767_v40, 0  ;;  %vm405_vm13 = vcmask 1046528   ;;  %v237_v48 = vld [vmem:[#allocation3] sm:$0x1]  ;;  %s785_s15 = sshll.u32 %s1040_s19, 4 }
  0x13   : > { %v258_v19 = vrot.slane %v256_v15, 7  ;;  %v238_v49 = vsel %vm921_vm5, 0, %v237_v48  ;;  %v240_v50 = vld [vmem:[#allocation3 + $0x8] sm:$0x1]  ;;  %v504_v52 = vld [vmem:[%s1028_s3] sm:$0x3]  ;;  %s224_s20 = scalar_lea.vmem %s1030_s5, %s785_s15 }
  0x14   : > { %v253_v21 = vor.u32 %v251_v14, %v250_v18  ;;  %v254_v22 = vrot.slane %v250_v18, 4  ;;  %239 = vst [vmem:[#allocation3] sm:$0x1] %v238_v49  ;;  %v241_v51 = vsel %vm929_vm6, 0, %v240_v50  ;;  %v773_v53 = vld [vmem:[%s1028_s3 + $0x2] sm:$0x3] }
  0x15   : > { %v261_v23 = vor.u32 %v259_v16, %v258_v19  ;;  %v263_v24 = vrot.slane %v258_v19, 4  ;;  %242 = vst [vmem:[#allocation3 + $0x8] sm:$0x1] %v241_v51  ;;  %v578_v54 = vsel %vm308_vm0, %v504_v52, 0  ;;  %v532_v55 = vsel %vm308_vm0, %v773_v53, 0 }
  0x16   : > { %v269_v25 = vld [vmem:[#allocation2] sm:$0xf]  ;;  %v778_v17 = vld [vmem:[%s1028_s3 + $0x4] sm:$0x3] }
  0x17   : > { %v274_v26 = vld [vmem:[#allocation2 + $0x8] sm:$0x1]  ;;  %v262_v27 = vsel %vm945_vm9, %v254_v22, %v261_v23  ;;  %v270_v28 = vsel %vm951_vm10, %v253_v21, %v269_v25  ;;  %v770_v3 = vld [vmem:[%s1027_s2] ss:$0 sm:$0xff] }
  0x18   : > { %v275_v29 = vsel %vm921_vm5, %v263_v24, %v274_v26  ;;  %271 = vst [vmem:[#allocation2] sm:$0xf] %v270_v28  ;;  %273 = vst.msk [vmem:[#allocation2 + $0x4] sm:$0xf] %vm267_vm8, %v262_v27 }
  0x19   : > { %276 = vst [vmem:[#allocation2 + $0x8] sm:$0x1] %v275_v29 }
  0x1b   : > { %v495_v22 = vld [vmem:[#allocation3] sm:$0xf] }
  0x1c   : > { %v499_v28 = vld [vmem:[#allocation3 + $0x8] sm:$0x1] }
  0x1f   : > { %v277_v30 = vld [vmem:[#allocation2] sm:$0xf]  ;;  %v278_v31 = vld [vmem:[#allocation2 + $0x4] sm:$0xf] }
  0x20   : > { %v763_v32 = vcombine.low %v277_v30, %v278_v31  ;;  %v851_v33 = vld [vmem:[#allocation2 + $0x8] ss:$0 sps:$4 sm:$0x11]   ;;  %v399_v37 = vld [vmem:[#allocation2] sm:$0xe] }
  0x21   : > { %v300_v36 = vshll.u32 %v851_v33, 16  ;;  %v768_v42 = vcombine.low %v399_v37, %v278_v31  ;;  %v407_v46 = vrot.slane %v851_v33, 1 }
  0x22   : > { %v293_v34 = vshrl.u32 %v763_v32, 16  ;;  %v295_v35 = vshll.u32 %v763_v32, 16  ;;  %813 = vmatmul.mubr.msk.bf16.vlgmr.msra.gmra.mxu1 %vm304_vm11, %v763_v32 }
  0x23   : > { %824 = vmatprep.mubr.msk.bf16.mxu1 %vm865_vm4, %v864_v2  ;;  %v302_v39 = vrot.slane %v300_v36, 1  ;;  %v406_v45 = vrot.slane %v768_v42, 1  ;;  %823 = vmatpush3.bf16.msra.mxu1 %v532_v55  ;;  %v634_v42 = vsel %vm308_vm0, %v778_v17, 0 }
  0x24   : > { %v297_v38 = vrot.slane %v295_v35, 1  ;;  %834 = vmatprep.subr.bf16.mxu1 %v864_v2 }
  0x25   : > { %v408_v47 = vsel %vm405_vm13, %v406_v45, %v407_v46 }
  0x26   : > { %v298_v41 = vor.u32 %v297_v38, %v293_v34 }
  0x28   : > { %v303_v44 = vsel %vm291_vm12, %v298_v41, %v302_v39 }
  0x29   : > { %807 = vmatmul.mubr.msk.bf16.vlgmr.msra.gmra.mxu0 %vm304_vm11, %v303_v44 }
  0x2a   : > { %817 = vmatpush3.bf16.msra.mxu0 %v413_v43  ;;  %818 = vmatprep.mubr.msk.bf16.mxu0 %vm865_vm4, %v864_v2 }
  0x2b   : > { %828 = vmatprep.subr.bf16.mxu0 %v864_v2 }
  0x31   : > { %819 = vmatmul.mubr.msk.bf16.vlgmr.msra.gmra.mxu0 %vm304_vm11, %v408_v47 }
  0x32   : > { %830 = vmatprep.mubr.msk.bf16.mxu0 %vm865_vm4, %v864_v2  ;;  %829 = vmatpush3.bf16.msra.mxu0 %v578_v54 }
  0xe2   : > { %v392_v56 = vpop.f32.mrf.mxu1 }
  0xe4   : > { %v814_v57 = vpop.f32.mrf.mxu1 }
  0xe5   : > { %v789_v57 = vld [vmem:[%s940_s27] sm:$0xff]  }
  0xe6   : > { %v395_v58 = vpop.f32.mrf.mxu1 }
  0xe8   : > { %v815_v59 = vpop.f32.mrf.mxu1 }
  0xe9   : > { %v346_v60 = vpop.f32.mrf.mxu0 }
  0xea   : > { %v393_v0 = vadd.f32 %v392_v56, %v346_v60 }
  0xeb   : > { %v808_v61 = vpop.f32.mrf.mxu0 }
  0xec   : > { %v790_v61 = vunpack.c.l.bf16 %v789_v57 }
  0xed   : > { %v349_v62 = vpop.f32.mrf.mxu0 }
  0xee   : > { %v396_v7 = vadd.f32 %v395_v58, %v349_v62 }
  0xef   : > { %v809_v63 = vpop.f32.mrf.mxu0 }
  0xf1   : > { %v449_v1 = vpop.f32.mrf.mxu0 }
  0xf2   : > { %v456_v4 = vadd.f32 %v449_v1, %v393_v0 }
  0xf3   : > { %v820_v5 = vpop.f32.mrf.mxu0 }
  0xf4   : > { %v465_v8 = vadd.f32 %v770_v3, %v456_v4  ;;  %v791_v5 = vunpack.c.h.bf16 %v789_v57 }
  0xf5   : > { %v452_v9 = vpop.f32.mrf.mxu0 }
  0xf6   : > { %v467_v10 = vmax.f32 %v465_v8, 0.0  ;;  %v457_v11 = vadd.f32 %v452_v9, %v396_v7 }
  0xf7   : > { %v821_v12 = vpop.f32.mrf.mxu0 }
  0xf8   : > { %v786_v13 = vpack.c.bf16 %v467_v10, %v467_v10  ;;  %v466_v14 = vadd.f32 %v770_v3, %v457_v11 }
  0xfa   : > { %v476_v15 = vshrl.u32 %v786_v13, 16  ;;  %v468_v16 = vmax.f32 %v466_v14, 0.0  ;;  %v479_v19 = vshll.u32 %v786_v13, 16 }
  0xfc   : > { %v478_v18 = vrot.slane %v476_v15, 7  ;;  %v787_v21 = vpack.c.bf16 %v468_v16, %v468_v16 }
  0xfe   : > { %v481_v23 = vor.u32 %v479_v19, %v478_v18  ;;  %v484_v24 = vshrl.u32 %v787_v21, 16  ;;  %v487_v27 = vshll.u32 %v787_v21, 16  ;;  %v482_v29 = vrot.slane %v478_v18, 4 }
 0x100   : > { %v496_v25 = vsel %vm951_vm10, %v481_v23, %v495_v22  ;;  %v486_v26 = vrot.slane %v484_v24, 7 }
 0x101   : > { %497 = vst [vmem:[#allocation3] sm:$0xf] %v496_v25 }
 0x102   : > { %v489_v30 = vor.u32 %v487_v27, %v486_v26  ;;  %v491_v31 = vrot.slane %v486_v26, 4 }
 0x104   : > { %v490_v32 = vsel %vm945_vm9, %v482_v29, %v489_v30  ;;  %v500_v33 = vsel %vm921_vm5, %v491_v31, %v499_v28 }
 0x105   : > { %498 = vst.msk [vmem:[#allocation3 + $0x4] sm:$0xf] %vm267_vm8, %v490_v32  ;;  %501 = vst [vmem:[#allocation3 + $0x8] sm:$0x1] %v500_v33 }
 0x108   : > { %v502_v34 = vld [vmem:[#allocation3] sm:$0xf] }
 0x109   : > { %v621_v43 = vld [vmem:[#allocation3] sm:$0xe] }
 0x10c   : > { %v503_v35 = vld [vmem:[#allocation3 + $0x4] sm:$0xf]  ;;  %v854_v36 = vld [vmem:[#allocation3 + $0x8] ss:$0 sps:$4 sm:$0x11]  }
 0x10d   : > { %v774_v20 = vcombine.low %v502_v34, %v503_v35  ;;  %v524_v38 = vshll.u32 %v854_v36, 16  ;;  %v779_v45 = vcombine.low %v621_v43, %v503_v35  ;;  %v628_v47 = vrot.slane %v854_v36, 1 }
 0x10f   : > { %831 = vmatmul.mubr.msk.bf16.vlgmr.msra.gmra.mxu0 %vm304_vm11, %v774_v20  ;;  %v519_v37 = vshll.u32 %v774_v20, 16  ;;  %v517_v39 = vshrl.u32 %v774_v20, 16  ;;  %v526_v6 = vrot.slane %v524_v38, 1  ;;  %v627_v46 = vrot.slane %v779_v45, 1 }
 0x111   : > { %v521_v40 = vrot.slane %v519_v37, 1  ;;  %v629_v48 = vsel %vm405_vm13, %v627_v46, %v628_v47 }
 0x113   : > { %v522_v41 = vor.u32 %v521_v40, %v517_v39 }
 0x115   : > { %v527_v44 = vsel %vm291_vm12, %v522_v41, %v526_v6 }
 0x116   : > { %825 = vmatmul.mubr.msk.bf16.vlgmr.msra.gmra.mxu1 %vm304_vm11, %v527_v44 }
 0x117   : > { %835 = vmatpush3.bf16.msra.mxu1 %v634_v42  ;;  %836 = vmatprep.mubr.msk.bf16.mxu1 %vm865_vm4, %v864_v2  ;;  %v781_v2 = vld [vmem:[%s1029_s4] ss:$0 sm:$0xff] }
 0x11e   : > { %837 = vmatmul.mubr.msk.bf16.vlgmr.msra.gmra.mxu1 %vm304_vm11, %v629_v48 }
 0x1cf   : > { %v614_v49 = vpop.f32.mrf.mxu0 }
 0x1d1   : > { %v832_v50 = vpop.f32.mrf.mxu0 }
 0x1d3   : > { %v617_v51 = vpop.f32.mrf.mxu0 }
 0x1d5   : > { %v833_v52 = vpop.f32.mrf.mxu0 }
 0x1d6   : > { %v568_v53 = vpop.f32.mrf.mxu1 }
 0x1d7   : > { %v615_v58 = vadd.f32 %v614_v49, %v568_v53 }
 0x1d8   : > { %v826_v54 = vpop.f32.mrf.mxu1 }
 0x1da   : > { %v571_v55 = vpop.f32.mrf.mxu1 }
 0x1db   : > { %v618_v63 = vadd.f32 %v617_v51, %v571_v55 }
 0x1dc   : > { %v827_v56 = vpop.f32.mrf.mxu1 }
 0x1de   : > { %v670_v59 = vpop.f32.mrf.mxu1 }
 0x1df   : > { %v677_v60 = vadd.f32 %v670_v59, %v615_v58 }
 0x1e0   : > { %v838_v62 = vpop.f32.mrf.mxu1 }
 0x1e1   : > { %v686_v0 = vadd.f32 %v781_v2, %v677_v60 }
 0x1e2   : > { %v673_v1 = vpop.f32.mrf.mxu1 }
 0x1e3   : > { %v692_v3 = vadd.f32 %v790_v61, %v686_v0  ;;  %v678_v4 = vadd.f32 %v673_v1, %v618_v63 }
 0x1e4   : > { %v839_v7 = vpop.f32.mrf.mxu1 }
 0x1e5   : > { %v694_v8 = vmax.f32 %v692_v3, 0.0  ;;  %v687_v9 = vadd.f32 %v781_v2, %v678_v4 }
 0x1e7   : > { %696 = vst.msk [vmem:[%s224_s20] sm:$0xff] %vm304_vm11, %v694_v8  ;;  %v693_v10 = vadd.f32 %v791_v5, %v687_v9 }
 0x1e9   : > { %v695_v11 = vmax.f32 %v693_v10, 0.0 }
 0x1eb   : > { %697 = vst.msk [vmem:[%s224_s20 + $0x8] sm:$0xff] %vm304_vm11, %v695_v11 }
 0x1ec PF: > { %s15_s18 = sadd.s32 1, %s862_s18  }
 0x1ed   : > { %p12_p4 = scmp.ge.s32.totalorder %s15_s18, 4  }
 0x1ef   :  { %14 = sbr.rel (!%p12_p4) target bundleno = 1 (0x1), region = 74 }

</bundles_post_ra>
